<compile_context>
chip_gen: v7x
topology: tpu7x:2x2x1
jax: 0.10.0
libtpu: 0.0.40
codegen_flags: <defaults>
</compile_context>

<pallas_src>
import jax
import jax.numpy as jnp
from jax.experimental import pallas as pl
from jax.experimental.pallas import tpu as pltpu

# Model dims (fixed by the PyTorch spec).
IN_FEATURES, H1, H2, OUT_FEATURES = 7, 32, 32, 14

LANE = 128                     # lane width / padded feature dim for h1/h2/out
K1 = 16                        # padded contraction dim of layer 1 (7 -> 16)
B_BASE = K1 + 2 * LANE         # row offset of the bias rows inside the packed params
P_ROWS = B_BASE + 8            # 16 (w1) + 128 (w2) + 128 (w3) + 8 (bias rows) = 280
MAX_BM = 1024                  # row-tile cap for large batches


def _round_up(x, m):
    return (x + m - 1) // m * m


def mlp_kernel(x_ref, p_ref, o_ref):
    x = x_ref[...]                                   # (BM, 16) bf16

    # Static slices of the single resident parameter buffer (free).
    w1 = p_ref[0:K1, :]                              # (16, 128) bf16
    w2 = p_ref[K1:K1 + LANE, :]                      # (128, 128) bf16
    w3 = p_ref[K1 + LANE:K1 + 2 * LANE, :]           # (128, 128) bf16
    b1 = p_ref[B_BASE:B_BASE + 1, :].astype(jnp.float32)        # (1, 128) f32
    b2 = p_ref[B_BASE + 1:B_BASE + 2, :].astype(jnp.float32)
    b3 = p_ref[B_BASE + 2:B_BASE + 3, :].astype(jnp.float32)

    # fc1 + relu (bf16 operands, f32 MXU accumulation; epilogue in f32).
    h1 = jnp.dot(x, w1, preferred_element_type=jnp.float32) + b1
    h1 = jnp.maximum(h1, 0.0)

    # fc2 + relu
    h2 = jnp.dot(h1.astype(jnp.bfloat16), w2,
                 preferred_element_type=jnp.float32) + b2
    h2 = jnp.maximum(h2, 0.0)

    # out (no activation)
    y = jnp.dot(h2.astype(jnp.bfloat16), w3,
                preferred_element_type=jnp.float32) + b3
    o_ref[...] = y.astype(o_ref.dtype)               # bf16, lane-dense store


def prepare_params(w1, b1, w2, b2, w3, b3):
    """One-time packing of all weights/biases into a single (280, 128) bf16 buffer.

    Rows  0:16   -> w1 zero-padded to (16, 128)
    Rows 16:144  -> w2 zero-padded to (128, 128)
    Rows 144:272 -> w3 zero-padded to (128, 128)
    Rows 272/273/274 -> b1 / b2 / b3 (zero-padded to 128 lanes)
    Zero padding contributes exactly zero to every dot, so numerics are unchanged.
    """
    p = jnp.zeros((P_ROWS, LANE), jnp.float32)
    p = p.at[0:w1.shape[0], 0:w1.shape[1]].set(w1)
    p = p.at[K1:K1 + w2.shape[0], 0:w2.shape[1]].set(w2)
    p = p.at[K1 + LANE:K1 + LANE + w3.shape[0], 0:w3.shape[1]].set(w3)
    p = p.at[B_BASE, 0:b1.shape[0]].set(b1.reshape(-1))
    p = p.at[B_BASE + 1, 0:b2.shape[0]].set(b2.reshape(-1))
    p = p.at[B_BASE + 2, 0:b3.shape[0]].set(b3.reshape(-1))
    return p.astype(jnp.bfloat16)


def mlp_forward(x, params):
    """Hot path: pad x, run the fused MLP kernel, slice/cast the real output."""
    B = x.shape[0]

    # Row tiling: single tile for small/medium B; for large B use BM=1024 so the
    # "parallel" grid axis has >= 2 steps (shards across the 2 TCs on v7x).
    if B <= MAX_BM:
        BM = _round_up(max(B, 16), 16)
        padded_B = BM
    else:
        BM = MAX_BM
        padded_B = _round_up(B, BM)
    grid_m = padded_B // BM

    # Only x is padded per call (rows to the tile multiple, cols 7 -> 16, bf16).
    x_p = jnp.pad(x, ((0, padded_B - B), (0, K1 - x.shape[1]))).astype(jnp.bfloat16)

    # Cost hint reflecting actual padded bf16 traffic.
    flops = 2 * padded_B * (K1 * LANE + LANE * LANE + LANE * LANE)
    bytes_accessed = 2 * (padded_B * K1        # x (bf16)
                          + P_ROWS * LANE      # packed params (bf16)
                          + padded_B * LANE)   # output (bf16)

    out_padded = pl.pallas_call(
        mlp_kernel,
        out_shape=jax.ShapeDtypeStruct((padded_B, LANE), jnp.bfloat16),
        grid=(grid_m,),
        in_specs=[
            pl.BlockSpec((BM, K1), lambda i: (i, 0)),       # x row tile (last dim == full)
            pl.BlockSpec((P_ROWS, LANE), lambda i: (0, 0)),  # packed params (resident)
        ],
        out_specs=pl.BlockSpec((BM, LANE), lambda i: (i, 0)),
        compiler_params=pltpu.CompilerParams(
            dimension_semantics=("parallel",)),
        cost_estimate=pl.CostEstimate(
            flops=flops, transcendentals=0, bytes_accessed=bytes_accessed),
    )(x_p, params)

    return out_padded[:B, :OUT_FEATURES].astype(jnp.float32)


def init_linear(key, in_dim, out_dim):
    # Deterministic init mimicking nn.Linear (uniform(-1/sqrt(in), 1/sqrt(in))).
    kw, kb = jax.random.split(key)
    bound = 1.0 / jnp.sqrt(in_dim)
    w = jax.random.uniform(kw, (in_dim, out_dim), jnp.float32, -bound, bound)
    b = jax.random.uniform(kb, (out_dim,), jnp.float32, -bound, bound)
    return w, b


if __name__ == "__main__":
    B = 8

    key = jax.random.PRNGKey(0)
    kx, k1, k2, k3 = jax.random.split(key, 4)

    x = jax.random.normal(kx, (B, IN_FEATURES), jnp.float32)
    w1, b1 = init_linear(k1, IN_FEATURES, H1)
    w2, b2 = init_linear(k2, H1, H2)
    w3, b3 = init_linear(k3, H2, OUT_FEATURES)

    # One-time parameter packing, outside the hot path.
    params = jax.block_until_ready(prepare_params(w1, b1, w2, b2, w3, b3))

    fwd = jax.jit(mlp_forward)
    out = fwd(x, params)
    jax.block_until_ready(out)

    # Reference in plain f32 JAX (kernel uses bf16 operands/output -> relaxed tolerance).
    ref = jnp.maximum(x @ w1 + b1, 0.0)
    ref = jnp.maximum(ref @ w2 + b2, 0.0)
    ref = ref @ w3 + b3

    assert out.shape == (B, OUT_FEATURES)
    assert jnp.allclose(out, ref, atol=3e-2, rtol=3e-2), (
        f"max abs err = {jnp.max(jnp.abs(out - ref))}")

    print("KERNEL_OK")
</pallas_src>

<mosaic_0001>
module attributes {stable_mosaic.version = 11 : i64} {
  func.func @mlp_kernel(%arg0: i32, %arg1: memref<16x16xbf16, #tpu.memory_space<vmem>>, %arg2: memref<280x128xbf16, #tpu.memory_space<vmem>>, %arg3: memref<16x128xbf16, #tpu.memory_space<vmem>>) attributes {dimension_semantics = [#tpu.dimension_semantics<parallel>], iteration_bounds = array<i64: 1>, scalar_prefetch = 0 : i64, scratch_operands = 0 : i64, tpu.core_type = #tpu.core_type<tc>, window_params = [{transform_indices = @transform_0, window_bounds = array<i64: 16, 16>}, {pipeline_mode = #tpu.pipeline_mode<synchronous>, transform_indices = @transform_1, window_bounds = array<i64: 280, 128>}, {transform_indices = @transform_2, window_bounds = array<i64: 16, 128>}]} {
    %c0 = arith.constant 0 : index
    %c0_0 = arith.constant 0 : index
    %0 = vector.load %arg1[%c0, %c0_0] : memref<16x16xbf16, #tpu.memory_space<vmem>>, vector<16x16xbf16>
    %c0_1 = arith.constant 0 : index
    %c0_2 = arith.constant 0 : index
    %1 = vector.load %arg2[%c0_1, %c0_2] : memref<280x128xbf16, #tpu.memory_space<vmem>>, vector<16x128xbf16>
    %c16 = arith.constant 16 : index
    %c0_3 = arith.constant 0 : index
    %2 = vector.load %arg2[%c16, %c0_3] : memref<280x128xbf16, #tpu.memory_space<vmem>>, vector<128x128xbf16>
    %c144 = arith.constant 144 : index
    %c0_4 = arith.constant 0 : index
    %3 = vector.load %arg2[%c144, %c0_4] : memref<280x128xbf16, #tpu.memory_space<vmem>>, vector<128x128xbf16>
    %c272 = arith.constant 272 : index
    %c0_5 = arith.constant 0 : index
    %4 = vector.load %arg2[%c272, %c0_5] : memref<280x128xbf16, #tpu.memory_space<vmem>>, vector<1x128xbf16>
    %5 = arith.extf %4 : vector<1x128xbf16> to vector<1x128xf32>
    %c273 = arith.constant 273 : index
    %c0_6 = arith.constant 0 : index
    %6 = vector.load %arg2[%c273, %c0_6] : memref<280x128xbf16, #tpu.memory_space<vmem>>, vector<1x128xbf16>
    %7 = arith.extf %6 : vector<1x128xbf16> to vector<1x128xf32>
    %c274 = arith.constant 274 : index
    %c0_7 = arith.constant 0 : index
    %8 = vector.load %arg2[%c274, %c0_7] : memref<280x128xbf16, #tpu.memory_space<vmem>>, vector<1x128xbf16>
    %9 = arith.extf %8 : vector<1x128xbf16> to vector<1x128xf32>
    %cst = arith.constant dense<0.000000e+00> : vector<16x128xf32>
    %10 = tpu.matmul %0, %1, %cst {dimension_numbers = #tpu.dot_dimension_numbers<[1], [0], [0], [1], [0, 0, 1, 1], [], []>} : vector<16x16xbf16>, vector<16x128xbf16>, vector<16x128xf32> -> vector<16x128xf32>
    %11 = vector.broadcast %5 : vector<1x128xf32> to vector<16x128xf32>
    %12 = arith.addf %10, %11 : vector<16x128xf32>
    %cst_8 = arith.constant 0.000000e+00 : f32
    %13 = vector.broadcast %cst_8 : f32 to vector<16x128xf32>
    %14 = arith.maximumf %12, %13 : vector<16x128xf32>
    %15 = arith.truncf %14 : vector<16x128xf32> to vector<16x128xbf16>
    %cst_9 = arith.constant dense<0.000000e+00> : vector<16x128xf32>
    %16 = tpu.matmul %15, %2, %cst_9 {dimension_numbers = #tpu.dot_dimension_numbers<[1], [0], [0], [1], [0, 0, 1, 1], [], []>} : vector<16x128xbf16>, vector<128x128xbf16>, vector<16x128xf32> -> vector<16x128xf32>
    %17 = vector.broadcast %7 : vector<1x128xf32> to vector<16x128xf32>
    %18 = arith.addf %16, %17 : vector<16x128xf32>
    %cst_10 = arith.constant 0.000000e+00 : f32
    %19 = vector.broadcast %cst_10 : f32 to vector<16x128xf32>
    %20 = arith.maximumf %18, %19 : vector<16x128xf32>
    %21 = arith.truncf %20 : vector<16x128xf32> to vector<16x128xbf16>
    %cst_11 = arith.constant dense<0.000000e+00> : vector<16x128xf32>
    %22 = tpu.matmul %21, %3, %cst_11 {dimension_numbers = #tpu.dot_dimension_numbers<[1], [0], [0], [1], [0, 0, 1, 1], [], []>} : vector<16x128xbf16>, vector<128x128xbf16>, vector<16x128xf32> -> vector<16x128xf32>
    %23 = vector.broadcast %9 : vector<1x128xf32> to vector<16x128xf32>
    %24 = arith.addf %22, %23 : vector<16x128xf32>
    %25 = arith.truncf %24 : vector<16x128xf32> to vector<16x128xbf16>
    %c0_12 = arith.constant 0 : index
    %c0_13 = arith.constant 0 : index
    %26 = vector.load %arg3[%c0_12, %c0_13] : memref<16x128xbf16, #tpu.memory_space<vmem>>, vector<16x128xbf16>
    tpu.vector_store %arg3[%c0_12, %c0_13], %25 {strides = array<i32>} : memref<16x128xbf16, #tpu.memory_space<vmem>>, vector<16x128xbf16>,
    return
  }
  func.func @transform_0(%arg0: i32) -> (i32, i32) {
    %c0_i32 = arith.constant 0 : i32
    %c0_i32_0 = arith.constant 0 : i32
    return %arg0, %c0_i32 : i32, i32
  }
  func.func @transform_1(%arg0: i32) -> (i32, i32) {
    %c0_i32 = arith.constant 0 : i32
    %c0_i32_0 = arith.constant 0 : i32
    %c0_i32_1 = arith.constant 0 : i32
    return %c0_i32, %c0_i32_0 : i32, i32
  }
  func.func @transform_2(%arg0: i32) -> (i32, i32) {
    %c0_i32 = arith.constant 0 : i32
    %c0_i32_0 = arith.constant 0 : i32
    return %arg0, %c0_i32 : i32, i32
  }
}

</mosaic_0001>

<bundles_post_ra>
// kernel: mlp_forward.1
= control target key start
LH: loop header
LB: loop body
LE: loop exit
PB: predicated region body
PF: predicated region fallthrough
CT: control target
= control target key end

     0   :  { %7 = vsyncpa [#allocation3], 0  ;;  %s474_s9 = smov [#allocation2]   ;;  %s532_s0 = inlined_call_operand.vmem [shape: bf16[16,16], index: 0, kind: input, shape index: {}]   ;;  %s533_s1 = inlined_call_operand.hbm [shape: bf16[280,128], index: 1, kind: input, shape index: {}]   ;;  %s534_s2 = inlined_call_operand.vmem [shape: bf16[16,128], index: 2, kind: output, shape index: {}]  }
   0x1   :  { %s15_s10 = sshll.u32 %s474_s9, 4  ;;  %s450_s13 = scalar_lea.hbm %s533_s1, 2240  ;;  %s16_s10 = int_to_ptr.vmem [resolvable:$true] %s15_s10 }
   0x2   :  { %p451_p0 = scmp.ne.s32.totalorder %s533_s1, %s450_s13  ;;  %p454_p1 = scmp.lt.u32.totalorder %s450_s13, %s533_s1 }
   0x4   :  { %p456_p2 = pnand %p454_p1, %p451_p0 }
   0x6   :  { %459 = shalt.err (!%p456_p2)
}
   0x7   :  { %s460_s18 = scalar_lea.vmem %s16_s10, 2240  ;;  %p465_p4 = scmp.lt.s32.totalorder %s16_s10, %s16_s10 }
   0x8   :  { %p461_p3 = scmp.ne.s32.totalorder %s16_s10, %s460_s18  ;;  %p466_p5 = scmp.lt.s32.totalorder %s460_s18, %s460_s18 }
   0xa   :  { %p467_p6 = por %p466_p5, %p465_p4 }
   0xc   :  { %p468_p7 = pnand %p467_p6, %p461_p3 }
   0xe   :  { %471 = shalt.err (!%p468_p7)
}
   0xf   :  { %s475_s19 = smov 64   ;;  %s476_s20 = smov 4  }
  0x10   :  { %21 = dma.hbm_to_vmem [thread:$0]  %s533_s1, 2240, %s16_s10, [#allocation3], %s475_s19, %s475_s19, %s476_s20  }
  0x11   :  { %472 = dma.done.wait [#allocation3], 2240  }
  0x12   :  { %473 = vsyncadd [#allocation3], 4294965056  ;;  %v477_v0 = vmov 0.0   ;;  %vm478_vm0 = vmmov 0   ;;  %v432_v1 = vld [vmem:[#allocation2] sm:$0xff]   ;;  %vm81_vm1 = vcmask 130048   ;;  %v66_v17 = vlaneseq }
  0x13   :  { %381 = vmatprep.subr.bf16.mxu0 %v477_v0  ;;  %383 = vmatprep.mubr.msk.bf16.mxu0 %vm478_vm0, %v477_v0  ;;  %v433_v2 = vld [vmem:[%s532_s0] sm:$0xff]   ;;  %v434_v3 = vld [vmem:[#allocation2 + $0x8] sm:$0xff]   ;;  %v435_v4 = vld [vmem:[#allocation2 + $0x10] sm:$0xff]  }
  0x14   :  { %387 = vmatprep.subr.bf16.mxu1 %v477_v0  ;;  %403 = vmatprep.mubr.msk.bf16.mxu1 %vm478_vm0, %v477_v0  ;;  %v436_v5 = vld [vmem:[#allocation2 + $0x18] sm:$0xff]   ;;  %v437_v6 = vld [vmem:[#allocation2 + $0x20] sm:$0xff]   ;;  %v438_v7 = vld [vmem:[#allocation2 + $0x28] sm:$0xff]   ;;  %v67_v18 = vshrl.u32 %v66_v17, 7 }
  0x15   :  { %382 = vmatpush3.bf16.msra.mxu0 %v432_v1  ;;  %388 = vmatpush3.bf16.msra.mxu1 %v434_v3  ;;  %v439_v8 = vld [vmem:[#allocation2 + $0x30] sm:$0xff]   ;;  %v440_v9 = vld [vmem:[#allocation2 + $0x38] sm:$0xff]   ;;  %v441_v10 = vld [vmem:[#allocation2 + $0x40] sm:$0xff]  }
  0x16   :  { %407 = vmatprep.subr.bf16.mxu0 %v477_v0  ;;  %389 = vmatprep.subr.bf16.mxu1 %v477_v0  ;;  %v442_v11 = vld [vmem:[#allocation2 + $0x48] sm:$0xff]   ;;  %v443_v12 = vld [vmem:[#allocation2 + $0x50] sm:$0xff]   ;;  %v444_v13 = vld [vmem:[#allocation2 + $0x58] sm:$0xff]   ;;  %v68_v21 = vsub.s32 0, %v67_v18  ;;  %v131_v34 = vsub.s32 1, %v67_v18  ;;  %v227_v47 = vsub.s32 2, %v67_v18 }
  0x17   :  { %v445_v14 = vld [vmem:[#allocation2 + $0x60] sm:$0xff]   ;;  %v446_v15 = vld [vmem:[#allocation2 + $0x68] sm:$0xff]   ;;  %v447_v16 = vld [vmem:[#allocation2 + $0x70] sm:$0xff]  }
  0x18   :  { %384 = vmatmul.mubr.msk.bf16.vlgmr.msra.gmra.mrb[0].mxu0 %vm81_vm1, %v433_v2  ;;  %v62_v19 = vld [vmem:[#allocation2 + $0x88] sm:$0x1]  ;;  %v448_v32 = vld [vmem:[#allocation2 + $0x78] sm:$0xff]   ;;  %v449_v33 = vld [vmem:[#allocation2 + $0x80] sm:$0xff]  }
  0x19   :  { %423 = vmatprep.mubr.msk.bf16.mxu0 %vm478_vm0, %v477_v0  ;;  %390 = vmatpush3.bf16.msra.mxu1 %v435_v4  ;;  %v63_v20 = vunpack.c.l.bf16 %v62_v19  ;;  %v64_v45 = vld [vmem:[#allocation2 + $0x88] sm:$0x2] }
  0x1a   :  { %391 = vmatprep.subr.bf16.mxu1 %v477_v0  ;;  %408 = vmatpush3.bf16.msra.mxu0 %v442_v11  ;;  %v65_v46 = vunpack.c.l.bf16 %v64_v45 }
  0x1b   :  { %409 = vmatprep.subr.bf16.mxu0 %v477_v0  ;;  %v69_v22 = vrot.slane %v63_v20, %v68_v21  ;;  %v132_v35 = vrot.slane %v63_v20, %v131_v34 }
  0x1c   :  { %v228_v48 = vrot.slane %v65_v46, %v227_v47 }
  0x1d   :  { %392 = vmatpush3.bf16.msra.mxu1 %v436_v5 }
  0x1e   :  { %393 = vmatprep.subr.bf16.mxu1 %v477_v0  ;;  %410 = vmatpush3.bf16.msra.mxu0 %v443_v12 }
  0x1f   :  { %411 = vmatprep.subr.bf16.mxu0 %v477_v0 }
  0x21   :  { %394 = vmatpush3.bf16.msra.mxu1 %v437_v6 }
  0x22   :  { %395 = vmatprep.subr.bf16.mxu1 %v477_v0  ;;  %412 = vmatpush3.bf16.msra.mxu0 %v444_v13 }
  0x23   :  { %413 = vmatprep.subr.bf16.mxu0 %v477_v0 }
  0x25   :  { %396 = vmatpush3.bf16.msra.mxu1 %v438_v7 }
  0x26   :  { %397 = vmatprep.subr.bf16.mxu1 %v477_v0  ;;  %414 = vmatpush3.bf16.msra.mxu0 %v445_v14 }
  0x27   :  { %415 = vmatprep.subr.bf16.mxu0 %v477_v0 }
  0x29   :  { %398 = vmatpush3.bf16.msra.mxu1 %v439_v8 }
  0x2a   :  { %399 = vmatprep.subr.bf16.mxu1 %v477_v0  ;;  %416 = vmatpush3.bf16.msra.mxu0 %v446_v15 }
  0x2b   :  { %417 = vmatprep.subr.bf16.mxu0 %v477_v0 }
  0x2d   :  { %400 = vmatpush3.bf16.msra.mxu1 %v440_v9 }
  0x2e   :  { %401 = vmatprep.subr.bf16.mxu1 %v477_v0  ;;  %418 = vmatpush3.bf16.msra.mxu0 %v447_v16 }
  0x2f   :  { %419 = vmatprep.subr.bf16.mxu0 %v477_v0 }
  0x31   :  { %402 = vmatpush3.bf16.msra.mxu1 %v441_v10 }
  0x32   :  { %420 = vmatpush3.bf16.msra.mxu0 %v448_v32 }
  0x33   :  { %421 = vmatprep.subr.bf16.mxu0 %v477_v0 }
  0x36   :  { %422 = vmatpush3.bf16.msra.mxu0 %v449_v33 }
  0xeb   :  { %v119_v23 = vpop.f32.mrb[0].mxu0 }
  0xec   :  { %v120_v24 = vadd.f32 %v119_v23, %v69_v22  ;;  %v385_v25 = vpop.f32.mrb[1].mxu0 }
  0xed   :  { %v122_v26 = vpop.f32.mrb[2].mxu0 }
  0xee   :  { %v123_v27 = vadd.f32 %v122_v26, %v69_v22  ;;  %v386_v28 = vpop.f32.mrb[3].mxu0  ;;  %v126_v29 = vmax.f32 %v120_v24, 0.0 }
  0xf0   :  { %v127_v30 = vmax.f32 %v123_v27, 0.0 }
  0xf2   :  { %v128_v31 = vpack.c.bf16 %v127_v30, %v126_v29 }
  0xf4   :  { %404 = vmatmul.mubr.bf16.vlgmr.msra.gmra.mrb[0].mxu1 %v128_v31 }
 0x1c7   :  { %v215_v36 = vpop.f32.mrb[0].mxu1 }
 0x1c8   :  { %v216_v37 = vadd.f32 %v215_v36, %v132_v35  ;;  %v405_v38 = vpop.f32.mrb[1].mxu1 }
 0x1c9   :  { %v218_v39 = vpop.f32.mrb[2].mxu1 }
 0x1ca   :  { %v219_v40 = vadd.f32 %v218_v39, %v132_v35  ;;  %v406_v41 = vpop.f32.mrb[3].mxu1  ;;  %v222_v42 = vmax.f32 %v216_v37, 0.0 }
 0x1cc   :  { %v223_v43 = vmax.f32 %v219_v40, 0.0 }
 0x1ce   :  { %v224_v44 = vpack.c.bf16 %v223_v43, %v222_v42 }
 0x1d0   :  { %424 = vmatmul.mubr.bf16.vlgmr.msra.gmra.mrb[4].mxu0 %v224_v44 }
 0x2a3   :  { %v311_v49 = vpop.f32.mrb[4].mxu0 }
 0x2a4   :  { %v425_v50 = vpop.f32.mrb[5].mxu0  ;;  %v312_v52 = vadd.f32 %v311_v49, %v228_v48 }
 0x2a5   :  { %v314_v51 = vpop.f32.mrb[6].mxu0 }
 0x2a6   :  { %v315_v53 = vadd.f32 %v314_v51, %v228_v48  ;;  %v426_v54 = vpop.f32.mrb[7].mxu0 }
 0x2a8   :  { %v359_v55 = vpack.c.bf16 %v315_v53, %v312_v52 }
 0x2aa   :  { %360 = vst [vmem:[%s534_s2] sm:$0xff] %v359_v55  }
 0x2ab   :  { %332 = vsyncpa [#allocation3], 1 }

</bundles_post_ra>
